<compile_context>
chip_gen: v7x
topology: tpu7x:2x2x1
jax: 0.10.0
libtpu: 0.0.40
codegen_flags: <defaults>
</compile_context>

<pallas_src>
import math

import jax
import jax.numpy as jnp
from jax import lax
from jax.experimental import pallas as pl
from jax.experimental.pallas import tpu as pltpu


def _round_up(x, m):
    return (x + m - 1) // m * m


def _bev_gather_kernel(vol_ref, cx_ref, ry_ref, out_ref):
    """grid = (batch, cd_tile, h_tile); one step = (TCD, tH*Wp) volume slab."""
    h_tile = pl.program_id(2)

    @pl.when(h_tile == 0)
    def _init():
        out_ref[...] = jnp.zeros_like(out_ref)

    ry = ry_ref[0]                              # (tH, Kp) matmul dtype
    cx = cx_ref[0]                              # (Wp, Kp) matmul dtype
    tH, Kp = ry.shape
    Wp = cx.shape[0]

    # Single broadcast multiply -> (THW, Kp) weight slab, MXU-ready (the
    # contraction dim THW is the sublane axis; no transpose, no compares).
    wslab = (ry[:, None, :] * cx[None, :, :]).reshape(tH * Wp, Kp)

    # MXU: (TCD, THW) . (THW, Kp) with f32 accumulation straight into the
    # resident f32 output block.
    out_ref[0] += lax.dot_general(
        vol_ref[0], wslab,
        dimension_numbers=(((1,), (0,)), ((), ())),
        preferred_element_type=jnp.float32)


def bev_feature_gatherer(volume, keypoint_xyz, voxel_offset, base_voxel_size,
                         stride, *, tile_cd=256, tile_h=16,
                         matmul_dtype=jnp.bfloat16):
    """volume: (N, C, D, H, W) dense voxel grid; keypoint_xyz: (N, K, 3).

    Returns (N, C*D, K) features, matching
    F.grid_sample(volume.view(N, C*D, H, W), grid).squeeze(2).
    """
    N, C, D, H, W = volume.shape
    CD = C * D
    K = keypoint_xyz.shape[1]
    assert H > 2 and W > 2, "grid_sample normalization divides by H-2 / W-2"

    # ---- hardware-aware padding / tile selection ----------------------------
    try:
        device_kind = jax.devices()[0].device_kind.lower()
    except Exception:
        device_kind = ""
    try:
        vmem_phys = int(pltpu.get_tpu_info().vmem_capacity_bytes)
    except Exception:
        vmem_phys = 64 * 1024 * 1024            # conservative (v7x) fallback
    vmem_cap = max(vmem_phys - (8 << 20), 16 << 20)

    # Lane-dense keypoint axis; 256-wide MXU on v6e/v7x, 4x128 MXU on v5e.
    k_align = 128 if "v5" in device_kind else 256
    Kp = max(_round_up(max(K, 1), 128), k_align)

    Wp = _round_up(W, 8)
    th_min = 128 // math.gcd(Wp, 128)           # smallest tH with tH*Wp % 128 == 0
    align_h = max(th_min, 8)
    tH = _round_up(max(tile_h, 1), align_h)

    CD16 = _round_up(CD, 16)
    TCD = min(_round_up(tile_cd, 16), CD16)
    # v7x megacore: ensure at least two parallel (n, cd) grid slices.
    if N * (-(-CD16 // TCD)) < 2 and CD16 >= 32:
        TCD = _round_up(-(-CD16 // 2), 16)

    itemsize = jnp.dtype(matmul_dtype).itemsize

    def _vmem_estimate(tcd, th):
        thw = th * Wp
        return (2 * tcd * thw * itemsize        # volume tiles (double-buffered)
                + 2 * th * Kp * itemsize        # Ry tiles
                + 2 * Wp * Kp * itemsize        # Cx tiles
                + 2 * tcd * Kp * 4              # f32 output tiles
                + 2 * thw * Kp * itemsize       # weight-slab intermediates
                + (2 << 20))                    # compiler headroom

    # Shrink tiles until the working set fits the physical VMEM of this chip.
    while _vmem_estimate(TCD, tH) > vmem_cap:
        new_th = _round_up(max(tH // 2, align_h), align_h)
        if new_th == tH:
            break
        tH = new_th
    while _vmem_estimate(TCD, tH) > vmem_cap:
        new_tcd = _round_up(max(TCD // 2, 16), 16)
        if new_tcd == TCD:
            break
        TCD = new_tcd

    Hp = _round_up(H, tH)
    CDp = _round_up(CD, TCD)
    THW = tH * Wp
    vmem_limit = int(min(max(_vmem_estimate(TCD, tH), 32 << 20), vmem_cap))

    # ---- wrapper-side layout plumbing (volume) -------------------------------
    vol = volume.reshape(N, CD, H, W)
    if (CDp, Hp, Wp) != (CD, H, W):
        vol = jnp.pad(vol, ((0, 0), (0, CDp - CD), (0, Hp - H), (0, Wp - W)))
    vol_flat = vol.reshape(N, CDp, Hp * Wp)
    if vol_flat.dtype != matmul_dtype:
        vol_flat = vol_flat.astype(matmul_dtype)

    # ---- precompute the factored bilinear one-hot weights (hoisted) ----------
    kp = keypoint_xyz[..., :2].astype(jnp.float32)           # (N, K, 2)
    off_x, off_y = float(voxel_offset[0]), float(voxel_offset[1])
    scale_x = float(base_voxel_size[0] * stride)
    scale_y = float(base_voxel_size[1] * stride)

    # compute_bev_indices: fractional BEV indices.
    ix = (kp[..., 0] - off_x) / scale_x
    iy = (kp[..., 1] - off_y) / scale_y
    # normalize_grid_sample_indices: clamp to [0, dim-1], scale by (dim-2).
    ix = jnp.clip(ix, 0.0, float(H - 1))
    iy = jnp.clip(iy, 0.0, float(W - 1))
    gx = 2.0 * (ix / float(H - 2)) - 1.0        # grid[..., 0] -> samples W axis
    gy = 2.0 * (iy / float(W - 2)) - 1.0        # grid[..., 1] -> samples H axis

    # F.grid_sample, bilinear, align_corners=False, padding_mode='zeros'.
    sx = ((gx + 1.0) * float(W) - 1.0) * 0.5    # column coordinate (W axis)
    sy = ((gy + 1.0) * float(H) - 1.0) * 0.5    # row coordinate (H axis)
    x0 = jnp.floor(sx)
    y0 = jnp.floor(sy)
    wx1 = sx - x0
    wx0 = 1.0 - wx1
    wy1 = sy - y0
    wy0 = 1.0 - wy1
    x0i = x0.astype(jnp.int32)
    x1i = x0i + 1
    y0i = y0.astype(jnp.int32)
    y1i = y0i + 1

    # Column factor (N, Wp, Kp) and row factor (N, Hp, Kp).  Out-of-range
    # corner indices either never match the iota or hit a zero-padded row /
    # column -> contribute 0, which is exactly grid_sample's zero padding.
    col = jnp.arange(Wp, dtype=jnp.int32)[None, :, None]
    cx = (jnp.where(col == x0i[:, None, :], wx0[:, None, :], 0.0)
          + jnp.where(col == x1i[:, None, :], wx1[:, None, :], 0.0))
    row = jnp.arange(Hp, dtype=jnp.int32)[None, :, None]
    ry = (jnp.where(row == y0i[:, None, :], wy0[:, None, :], 0.0)
          + jnp.where(row == y1i[:, None, :], wy1[:, None, :], 0.0))
    cx = jnp.pad(cx, ((0, 0), (0, 0), (0, Kp - K))).astype(matmul_dtype)
    ry = jnp.pad(ry, ((0, 0), (0, 0), (0, Kp - K))).astype(matmul_dtype)

    out = pl.pallas_call(
        _bev_gather_kernel,
        out_shape=jax.ShapeDtypeStruct((N, CDp, Kp), jnp.float32),
        grid_spec=pltpu.PrefetchScalarGridSpec(
            num_scalar_prefetch=0,
            grid=(N, CDp // TCD, Hp // tH),
            in_specs=[
                pl.BlockSpec((1, TCD, THW), lambda n, c, h: (n, c, h)),
                pl.BlockSpec((1, Wp, Kp), lambda n, c, h: (n, 0, 0)),
                pl.BlockSpec((1, tH, Kp), lambda n, c, h: (n, h, 0)),
            ],
            out_specs=pl.BlockSpec((1, TCD, Kp), lambda n, c, h: (n, c, 0)),
        ),
        compiler_params=pltpu.CompilerParams(
            dimension_semantics=("parallel", "parallel", "arbitrary"),
            vmem_limit_bytes=vmem_limit),
    )(vol_flat, cx, ry)

    return out[:, :CD, :K]


def _reference(volume, keypoint_xyz, voxel_offset, base_voxel_size, stride):
    """Pure-JAX replica of the PyTorch forward (for a correctness check)."""
    N, C, D, H, W = volume.shape
    vol = volume.reshape(N, C * D, H, W)
    xy = keypoint_xyz[..., :2]
    ix = (xy[..., 0] - voxel_offset[0]) / (base_voxel_size[0] * stride)
    iy = (xy[..., 1] - voxel_offset[1]) / (base_voxel_size[1] * stride)
    ix = jnp.clip(ix, 0.0, H - 1.0)
    iy = jnp.clip(iy, 0.0, W - 1.0)
    gx = 2.0 * ix / (H - 2.0) - 1.0
    gy = 2.0 * iy / (W - 2.0) - 1.0
    sx = ((gx + 1.0) * W - 1.0) / 2.0
    sy = ((gy + 1.0) * H - 1.0) / 2.0
    x0 = jnp.floor(sx); y0 = jnp.floor(sy)
    x1 = x0 + 1.0;      y1 = y0 + 1.0
    wx1 = sx - x0; wx0 = 1.0 - wx1
    wy1 = sy - y0; wy0 = 1.0 - wy1

    def gather(xf, yf, w):
        valid = (xf >= 0) & (xf <= W - 1) & (yf >= 0) & (yf <= H - 1)
        xi = jnp.clip(xf.astype(jnp.int32), 0, W - 1)
        yi = jnp.clip(yf.astype(jnp.int32), 0, H - 1)
        vals = jax.vmap(lambda v, yy, xx: v[:, yy, xx])(vol, yi, xi)
        return vals * (w * valid)[:, None, :]

    return (gather(x0, y0, wx0 * wy0) + gather(x1, y0, wx1 * wy0) +
            gather(x0, y1, wx0 * wy1) + gather(x1, y1, wx1 * wy1))


if __name__ == "__main__":
    key = jax.random.PRNGKey(0)
    N, C, D, H, W, K = 2, 4, 4, 16, 16, 8
    voxel_offset = (0.0, 0.0, -3.0)        # cfg voxel_offset
    base_voxel_size = (0.1, 0.1, 0.2)      # cfg base voxel size
    stride = 4                             # cfg.strides[-1]

    k1, k2 = jax.random.split(key)
    volume = jax.random.normal(k1, (N, C, D, H, W), dtype=jnp.float32)
    keypoint_xyz = jax.random.uniform(k2, (N, K, 3), dtype=jnp.float32,
                                      minval=0.0, maxval=6.4)

    ref = _reference(volume, keypoint_xyz, voxel_offset, base_voxel_size,
                     stride)

    # f32 matmul path: tight check against the pure-JAX reference.
    out_f32 = bev_feature_gatherer(volume, keypoint_xyz, voxel_offset,
                                   base_voxel_size, stride,
                                   matmul_dtype=jnp.float32)
    out_f32 = jax.block_until_ready(out_f32)
    assert out_f32.shape == (N, C * D, K), out_f32.shape
    assert jnp.allclose(out_f32, ref, atol=1e-4, rtol=1e-4)

    # Default optimized path: bf16 factors / matmul inputs, f32 accumulation.
    out_bf16 = bev_feature_gatherer(volume, keypoint_xyz, voxel_offset,
                                    base_voxel_size, stride)
    out_bf16 = jax.block_until_ready(out_bf16)
    assert out_bf16.shape == (N, C * D, K), out_bf16.shape
    assert jnp.allclose(out_bf16, ref, atol=5e-2, rtol=5e-2)

    print("KERNEL_OK")
</pallas_src>

<mosaic_0001>
module attributes {stable_mosaic.version = 11 : i64} {
  func.func @_bev_gather_kernel(%arg0: i32, %arg1: i32, %arg2: i32, %arg3: memref<1x16x256xf32, #tpu.memory_space<vmem>>, %arg4: memref<1x16x256xf32, #tpu.memory_space<vmem>>, %arg5: memref<1x16x256xf32, #tpu.memory_space<vmem>>, %arg6: memref<1x16x256xf32, #tpu.memory_space<vmem>>) attributes {dimension_semantics = [#tpu.dimension_semantics<parallel>, #tpu.dimension_semantics<parallel>, #tpu.dimension_semantics<arbitrary>], iteration_bounds = array<i64: 2, 1, 1>, scalar_prefetch = 0 : i64, scratch_operands = 0 : i64, tpu.core_type = #tpu.core_type<tc>, window_params = [{transform_indices = @transform_0, window_bounds = array<i64: 1, 16, 256>}, {transform_indices = @transform_1, window_bounds = array<i64: 1, 16, 256>}, {transform_indices = @transform_2, window_bounds = array<i64: 1, 16, 256>}, {transform_indices = @transform_3, window_bounds = array<i64: 1, 16, 256>}]} {
    %c0_i32 = arith.constant 0 : i32
    %0 = arith.cmpi eq, %arg2, %c0_i32 : i32
    %1 = arith.extui %0 : i1 to i32
    %c0_i32_0 = arith.constant 0 : i32
    %2 = arith.cmpi ne, %1, %c0_i32_0 : i32
    scf.if %2 {
      %cst_15 = arith.constant 0.000000e+00 : f32
      %22 = vector.broadcast %cst_15 : f32 to vector<1x16x256xf32>
      %c0_16 = arith.constant 0 : index
      %c0_17 = arith.constant 0 : index
      %c0_18 = arith.constant 0 : index
      %23 = vector.load %arg6[%c0_16, %c0_17, %c0_18] : memref<1x16x256xf32, #tpu.memory_space<vmem>>, vector<1x16x256xf32>
      tpu.vector_store %arg6[%c0_16, %c0_17, %c0_18], %22 {strides = array<i32>} : memref<1x16x256xf32, #tpu.memory_space<vmem>>, vector<1x16x256xf32>,
    } else {
    }
    %c0 = arith.constant 0 : index
    %c0_1 = arith.constant 0 : index
    %c0_2 = arith.constant 0 : index
    %3 = vector.load %arg5[%c0, %c0_1, %c0_2] : memref<1x16x256xf32, #tpu.memory_space<vmem>>, vector<1x16x256xf32>
    %4 = vector.shape_cast %3 : vector<1x16x256xf32> to vector<16x256xf32>
    %c0_3 = arith.constant 0 : index
    %c0_4 = arith.constant 0 : index
    %c0_5 = arith.constant 0 : index
    %5 = vector.load %arg4[%c0_3, %c0_4, %c0_5] : memref<1x16x256xf32, #tpu.memory_space<vmem>>, vector<1x16x256xf32>
    %6 = vector.shape_cast %5 : vector<1x16x256xf32> to vector<16x256xf32>
    %7 = vector.shape_cast %4 : vector<16x256xf32> to vector<16x1x256xf32>
    %8 = vector.shape_cast %6 : vector<16x256xf32> to vector<1x16x256xf32>
    %9 = vector.broadcast %7 : vector<16x1x256xf32> to vector<16x16x256xf32>
    %10 = vector.broadcast %8 : vector<1x16x256xf32> to vector<16x16x256xf32>
    %11 = arith.mulf %9, %10 : vector<16x16x256xf32>
    %12 = vector.shape_cast %11 : vector<16x16x256xf32> to vector<256x256xf32>
    %c0_6 = arith.constant 0 : index
    %c0_7 = arith.constant 0 : index
    %c0_8 = arith.constant 0 : index
    %13 = vector.load %arg6[%c0_6, %c0_7, %c0_8] : memref<1x16x256xf32, #tpu.memory_space<vmem>>, vector<1x16x256xf32>
    %14 = vector.shape_cast %13 : vector<1x16x256xf32> to vector<16x256xf32>
    %c0_9 = arith.constant 0 : index
    %c0_10 = arith.constant 0 : index
    %c0_11 = arith.constant 0 : index
    %15 = vector.load %arg3[%c0_9, %c0_10, %c0_11] : memref<1x16x256xf32, #tpu.memory_space<vmem>>, vector<1x16x256xf32>
    %16 = vector.shape_cast %15 : vector<1x16x256xf32> to vector<16x256xf32>
    %cst = arith.constant dense<0.000000e+00> : vector<16x256xf32>
    %17 = tpu.matmul %16, %12, %cst {dimension_numbers = #tpu.dot_dimension_numbers<[1], [0], [0], [1], [0, 0, 1, 1], [], []>} : vector<16x256xf32>, vector<256x256xf32>, vector<16x256xf32> -> vector<16x256xf32>
    %18 = arith.addf %14, %17 : vector<16x256xf32>
    %c0_12 = arith.constant 0 : index
    %c0_13 = arith.constant 0 : index
    %c0_14 = arith.constant 0 : index
    %19 = vector.load %arg6[%c0_12, %c0_13, %c0_14] : memref<1x16x256xf32, #tpu.memory_space<vmem>>, vector<1x16x256xf32>
    %20 = vector.shape_cast %19 : vector<1x16x256xf32> to vector<16x256xf32>
    %21 = vector.shape_cast %18 : vector<16x256xf32> to vector<1x16x256xf32>
    tpu.vector_store %arg6[%c0_12, %c0_13, %c0_14], %21 {strides = array<i32>} : memref<1x16x256xf32, #tpu.memory_space<vmem>>, vector<1x16x256xf32>,
    return
  }
  func.func @transform_0(%arg0: i32, %arg1: i32, %arg2: i32) -> (i32, i32, i32) {
    %c0_i32 = arith.constant 0 : i32
    return %arg0, %arg1, %arg2 : i32, i32, i32
  }
  func.func @transform_1(%arg0: i32, %arg1: i32, %arg2: i32) -> (i32, i32, i32) {
    %c0_i32 = arith.constant 0 : i32
    %c0_i32_0 = arith.constant 0 : i32
    %c0_i32_1 = arith.constant 0 : i32
    return %arg0, %c0_i32, %c0_i32_0 : i32, i32, i32
  }
  func.func @transform_2(%arg0: i32, %arg1: i32, %arg2: i32) -> (i32, i32, i32) {
    %c0_i32 = arith.constant 0 : i32
    %c0_i32_0 = arith.constant 0 : i32
    return %arg0, %arg2, %c0_i32 : i32, i32, i32
  }
  func.func @transform_3(%arg0: i32, %arg1: i32, %arg2: i32) -> (i32, i32, i32) {
    %c0_i32 = arith.constant 0 : i32
    %c0_i32_0 = arith.constant 0 : i32
    return %arg0, %arg1, %c0_i32 : i32, i32, i32
  }
}

</mosaic_0001>

<bundles_post_ra>
// kernel: tpu_custom_call.1
= control target key start
LH: loop header
LB: loop body
LE: loop exit
PB: predicated region body
PF: predicated region fallthrough
CT: control target
= control target key end

     0   :  { %s1729_s0 = inlined_call_operand.hbm [shape: f32[2,16,256], index: 0, kind: input, shape index: {}]   ;;  %s1730_s1 = inlined_call_operand.hbm [shape: f32[2,16,256], index: 1, kind: input, shape index: {}]   ;;  %s1731_s2 = inlined_call_operand.hbm [shape: f32[2,16,256], index: 2, kind: input, shape index: {}]   ;;  %s1732_s3 = inlined_call_operand.hbm [shape: f32[2,16,256], index: 3, kind: output, shape index: {}]  }
   0x1   :  { %1742 = sst [smem:[#allocation15_spill]] %s1730_s1 }
   0x2   :  { %8 = vsyncpa [#allocation3], 0 }
   0x3   :  { %10 = vsyncpa [#allocation3 + $0x1], 0 }
   0x4   :  { %11 = vsyncpa [#allocation6], 0 }
   0x5   :  { %13 = vsyncpa [#allocation6 + $0x1], 0 }
   0x6   :  { %14 = vsyncpa [#allocation4], 0 }
   0x7   :  { %16 = vsyncpa [#allocation4 + $0x1], 0  ;;  %s1311_s12 = smov 0   ;;  %s1313_s13 = smov 0  }
   0x8   :  { %s1315_s14 = smov 0   ;;  %s1317_s15 = smov 0  }
   0x9   :  { %s1319_s16 = smov 0   ;;  %s1321_s17 = smov 0  }
   0xa LB: > { %1743 = sst [smem:[#allocation12_spill]] %s1276_s16  ;;  %s1342_s18 = sadd.s32 4294967295, %s1280_s17   ;;  %s1280_s17 = sphi %s1321_s17, %s22_s17   ;;  %s1276_s16 = sphi %s1319_s16, %s1766_s16   ;;  %s1272_s15 = sphi %s1317_s15, %s1765_s15   ;;  %s1268_s14 = sphi %s1315_s14, %s1769_s14   ;;  %s1264_s13 = sphi %s1313_s13, %s1768_s13   ;;  %s1260_s12 = sphi %s1311_s12, %s1767_s12  }
   0xb   : > { %s898_s19 = sadd.s32 4294967294, %s1280_s17   ;;  %s41_s20 = sadd.s32 1, %s1276_s16 }
   0xc   : > { %s52_s21 = sadd.s32 1, %s1268_s14  ;;  %p43_p0 = scmp.ge.s32.totalorder %s41_s20, 2 }
   0xd   : > { %p59_p1 = scmp.ne.s32.totalorder %s1268_s14, %s1264_s13  ;;  %p60_p2 = scmp.eq.s32.totalorder %s1280_s17, 0 }
   0xe   : > { %p65_p3 = scmp.ne.s32.totalorder %s1264_s13, %s1260_s12  ;;  %s1771_s20 = smov (%p43_p0, %s41_s20), 0 }
   0xf   : > { %1744 = sst [smem:[#allocation13_spill]] %s1771_s20  ;;  %p1354_p4 = por %p60_p2, %p59_p1 }
  0x10   : > { %p66_p5 = scmp.eq.s32.totalorder %s1342_s18, 0  ;;  %s45_s23 = ssub.s32 %s1276_s16, %s1771_s20 }
  0x11   : > { %p145_p6 = scmp.eq.s32.totalorder %s1342_s18, 1  ;;  %p50_p7 = scmp.eq.s32.totalorder %s45_s23, 0 }
  0x12   : > { %p1362_p8 = por %p66_p5, %p65_p3  ;;  %p151_p10 = scmp.eq.s32.totalorder %s898_s19, 1 }
  0x13   : > { %p1366_p9 = por %p145_p6, %p59_p1  ;;  %p1042_p13 = scmp.lt.s32.totalorder %s1280_s17, 2 }
  0x14   : > { %s1746_s24 = scalar_select %p1362_p8, 1, 0 }
  0x15   : > { %s1747_s25 = scalar_select %p1366_p9, 1, 0 }
  0x16   : > { %s1371_s26 = scalar_select %p50_p7, %s1268_s14, %s52_s21  }
  0x17   : > { %p1373_p11 = por %p151_p10, %p65_p3  ;;  %s1735_s28 = sand.u32 1, %s1268_s14  }
  0x18   : > { %1748 = sst [smem:[#allocation14_spill]] %s1371_s26  ;;  %s1382_s29 = sshll.u32 %s1735_s28, 5 }
  0x19   : > { %s1749_s27 = scalar_select %p1373_p11, 1, 0 }
  0x1a   : > { %s1385_s30 = sshll.u32 %s1276_s16, 9  ;;  %p1389_p0 = pnand %p1042_p13, %p1354_p4 }
  0x1b   : > { %s197_s5 = sand.u32 1, %s1280_s17   ;;  %s1751_s1 = sld [smem:[#allocation15_spill]] }
  0x1c   : > { %s201_s9 = scalar_lea.vmem [#allocation5], %s1382_s29  ;;  %s1405_s11 = scalar_lea.sflag [#allocation6], %s197_s5 }
  0x1d   : > { %s208_s10 = sshll.u32 %s201_s9, 4  ;;  %p1411_p4 = pneg %p1389_p0  ;;  %s1402_s10 = int_to_ptr.vmem [resolvable:$true] %s208_s10 }
  0x21   : > { %s1398_s8 = scalar_lea.hbm %s1751_s1, %s1385_s30  ;;  %s1109_s6 = scalar_lea.hbm %s1751_s1, 1024 }
  0x22   : > { %s1104_s19 = scalar_lea.hbm %s1398_s8, 512  ;;  %p1110_p7 = scmp.lt.u32.totalorder %s1398_s8, %s1751_s1 }
  0x23   : > { %p1105_p3 = scmp.ne.s32.totalorder %s1398_s8, %s1104_s19  ;;  %p1111_p10 = scmp.lt.u32.totalorder %s1109_s6, %s1104_s19 }
  0x24   : > { %p1113_p12 = scmp.lt.u32.totalorder %s1104_s19, %s1398_s8 }
  0x25   : > { %p1107_p5 = pnand %p1411_p4, %p1105_p3  ;;  %p1112_p13 = por %p1111_p10, %p1110_p7 }
  0x27   : > { %p1108_p6 = pneg %p1107_p5  ;;  %p1114_p1 = por %p1113_p12, %p1112_p13 }
  0x29   : > { %p1115_p2 = pnand %p1114_p1, %p1108_p6 }
  0x2b   : > { %1118 = shalt.err (!%p1115_p2)
}
  0x2c   : > { %s1119_s5 = scalar_lea.vmem %s1402_s10, 512  ;;  %s1282_s22 = smov [#allocation5]  }
  0x2d   : > { %p1120_p3 = scmp.ne.s32.totalorder %s1402_s10, %s1119_s5  ;;  %s1124_s23 = sshll.u32 %s1282_s22, 4  ;;  %s1125_s23 = int_to_ptr.vmem [resolvable:$false] %s1124_s23 }
  0x2e   : > { %s1126_s7 = scalar_lea.vmem %s1125_s23, 1024  ;;  %p1127_p9 = scmp.lt.s32.totalorder %s1402_s10, %s1125_s23 }
  0x2f   : > { %p1122_p5 = pnand %p1120_p3, %p1411_p4  ;;  %p1128_p8 = scmp.lt.s32.totalorder %s1126_s7, %s1119_s5 }
  0x31   : > { %p1123_p11 = pneg %p1122_p5  ;;  %p1129_p7 = por %p1128_p8, %p1127_p9 }
  0x33   : > { %p1130_p10 = pnand %p1129_p7, %p1123_p11 }
  0x35   : > { %1133 = shalt.err (!%p1130_p10)
}
  0x36   : > { %s1736_s19 = smov 256   ;;  %s1738_s6 = smov 16  }
  0x37   : > { %1034 = dma.hbm_to_vmem [thread:$0]  (!%p1389_p0), %s1398_s8, 512, %s1402_s10, %s1405_s11, %s1736_s19, %s1736_s19, %s1738_s6  }
  0x38   : > { %p1753_p8 = scmp.lt.s32.totalorder %s1280_s17, 3  ;;  %p1754_p9 = scmp.ge.s32.totalorder %s1280_s17, 1 }
  0x39   : > { %s1450_s23 = scalar_lea.hbm %s1729_s0, %s1385_s30  ;;  %s175_s7 = scalar_lea.vmem [#allocation2], %s1382_s29 }
  0x3a   : > { %p1442_p11 = pnand %p1754_p9, %p1753_p8  ;;  %s187_s28 = sshll.u32 %s175_s7, 4  ;;  %s1453_s28 = int_to_ptr.vmem [resolvable:$true] %s187_s28 }
  0x3b   : > { %s1459_s19 = scalar_lea.hbm %s1731_s2, %s1385_s30  ;;  %s1756_s6 = sand.u32 1, %s1268_s14  }
  0x3c   : > { %s1755_s9 = scalar_select %p1442_p11, 1, 0 }
  0x3d   : > { %s1463_s1 = scalar_lea.sflag [#allocation3], %s1756_s6  ;;  %s1134_s20 = scalar_lea.hbm %s1450_s23, 512 }
  0x3e   : > { %p1135_p12 = scmp.ne.s32.totalorder %s1450_s23, %s1134_s20  ;;  %s1139_s16 = scalar_lea.hbm %s1729_s0, 1024 }
  0x3f   : > { %p1140_p6 = scmp.lt.u32.totalorder %s1450_s23, %s1729_s0  ;;  %p1141_p13 = scmp.lt.u32.totalorder %s1139_s16, %s1134_s20 }
  0x40   : > { %p1137_p1 = pnand %p1135_p12, %p1411_p4  ;;  %p1143_p5 = scmp.lt.u32.totalorder %s1134_s20, %s1450_s23 }
  0x41   : > { %p1142_p3 = por %p1141_p13, %p1140_p6 }
  0x42   : > { %p1138_p2 = pneg %p1137_p1 }
  0x43   : > { %p1144_p7 = por %p1143_p5, %p1142_p3 }
  0x45   : > { %p1145_p10 = pnand %p1144_p7, %p1138_p2 }
  0x47   : > { %1148 = shalt.err (!%p1145_p10)
}
  0x48   : > { %s1149_s30 = scalar_lea.vmem %s1453_s28, 512  ;;  %s1285_s6 = smov [#allocation2]  }
  0x49   : > { %p1150_p8 = scmp.ne.s32.totalorder %s1453_s28, %s1149_s30  ;;  %s1154_s8 = sshll.u32 %s1285_s6, 4  ;;  %s1155_s8 = int_to_ptr.vmem [resolvable:$false] %s1154_s8 }
  0x4a   : > { %s1156_s26 = scalar_lea.vmem %s1155_s8, 1024  ;;  %p1157_p1 = scmp.lt.s32.totalorder %s1453_s28, %s1155_s8 }
  0x4b   : > { %p1152_p9 = pnand %p1150_p8, %p1411_p4  ;;  %p1158_p11 = scmp.lt.s32.totalorder %s1156_s26, %s1149_s30 }
  0x4d   : > { %p1153_p12 = pneg %p1152_p9  ;;  %p1159_p6 = por %p1158_p11, %p1157_p1 }
  0x4f   : > { %p1160_p13 = pnand %p1159_p6, %p1153_p12 }
  0x51   : > { %1163 = shalt.err (!%p1160_p13)
}
  0x52   : > { %s1757_s16 = smov 16   ;;  %s1758_s20 = smov 256  }
  0x53   : > { %1031 = dma.hbm_to_vmem [thread:$0]  (!%p1389_p0), %s1450_s23, 512, %s1453_s28, %s1463_s1, %s1758_s20, %s1758_s20, %s1757_s16  }
  0x54   : > { %s222_s10 = scalar_lea.vmem [#allocation7], %s1382_s29  ;;  %s1164_s22 = scalar_lea.hbm %s1459_s19, 512 }
  0x55   : > { %s232_s5 = sshll.u32 %s222_s10, 4  ;;  %p1165_p11 = scmp.ne.s32.totalorder %s1459_s19, %s1164_s22  ;;  %s1491_s5 = int_to_ptr.vmem [resolvable:$true] %s232_s5 }
  0x56   : > { %s1169_s6 = scalar_lea.hbm %s1731_s2, 1024  ;;  %p1170_p5 = scmp.lt.u32.totalorder %s1459_s19, %s1731_s2 }
  0x57   : > { %p1167_p2 = pnand %p1165_p11, %p1411_p4  ;;  %p1171_p7 = scmp.lt.u32.totalorder %s1169_s6, %s1164_s22 }
  0x58   : > { %p1173_p8 = scmp.lt.u32.totalorder %s1164_s22, %s1459_s19 }
  0x59   : > { %p1168_p3 = pneg %p1167_p2  ;;  %p1172_p10 = por %p1171_p7, %p1170_p5 }
  0x5b   : > { %p1174_p9 = por %p1173_p8, %p1172_p10 }
  0x5d   : > { %p1175_p12 = pnand %p1174_p9, %p1168_p3 }
  0x5f   : > { %1178 = shalt.err (!%p1175_p12)
}
  0x60   : > { %s1179_s1 = scalar_lea.vmem %s1491_s5, 512  ;;  %s1286_s28 = smov [#allocation7]  }
  0x61   : > { %p1180_p1 = scmp.ne.s32.totalorder %s1491_s5, %s1179_s1  ;;  %s1184_s29 = sshll.u32 %s1286_s28, 4  ;;  %s1185_s29 = int_to_ptr.vmem [resolvable:$false] %s1184_s29 }
  0x62   : > { %s1186_s23 = scalar_lea.vmem %s1185_s29, 1024  ;;  %p1187_p11 = scmp.lt.s32.totalorder %s1491_s5, %s1185_s29 }
  0x63   : > { %p1182_p6 = pnand %p1180_p1, %p1411_p4  ;;  %p1188_p2 = scmp.lt.s32.totalorder %s1186_s23, %s1179_s1 }
  0x65   : > { %p1183_p13 = pneg %p1182_p6  ;;  %p1189_p5 = por %p1188_p2, %p1187_p11 }
  0x67   : > { %p1190_p7 = pnand %p1189_p5, %p1183_p13 }
  0x69   : > { %1193 = shalt.err (!%p1190_p7)
}
  0x6a   : > { %1037 = dma.hbm_to_vmem [thread:$0]  (!%p1389_p0), %s1459_s19, 512, %s1491_s5, %s1405_s11, %s1758_s20, %s1758_s20, %s1757_s16  }
  0x6b   : > { %p1759_p4 = scmp.ne.s32.totalorder %s1755_s9, 0 }
  0x6c   : > { %s1521_s21 = sand.u32 (!%p1759_p4), 1, %s1264_s13   ;;  %p1760_p3 = scmp.ne.s32.totalorder (!%p1759_p4), %s1746_s24, 0 }
  0x6d   : > { %244 = sbr.rel (%p1759_p4) target bundleno = 429 (0x1ad), region = 32  ;;  %s1524_s10 = sshll.u32 (!%p1759_p4), %s1521_s21, 5 }
  0x6e   : > { %s247_s4 = scalar_lea.sflag (!%p1759_p4), [#allocation3], %s1521_s21  ;;  %s1528_s22 = scalar_lea.vmem (!%p1759_p4), [#allocation2], %s1524_s10 }
  0x74   : > { %1247 = dma.done.wait (%p1760_p3), %s247_s4, 512  }
  0x75   : > { %1249 = vsyncadd (%p1760_p3), %s247_s4, 4294966784  ;;  %s255_s11 = sand.u32 1, %s1342_s18   ;;  %s259_s9 = scalar_lea.vmem [#allocation5], %s1524_s10 }
  0x76   : > { %s256_s19 = scalar_lea.sflag [#allocation6], %s255_s11 }
  0x77   : > { %1251 = dma.done.wait (%p1760_p3), %s256_s19, 1024  }
  0x78   : > { %1253 = vsyncadd (%p1760_p3), %s256_s19, 4294966272  ;;  %v330_v0 = vlaneseq  ;;  %v1287_v1 = vmov 1966171168   ;;  %s1543_s16 = scalar_lea.vmem [#allocation7], %s1524_s10  ;;  %v654_v12 = vld [vmem:[%s1528_s22 + $0x8] sm:$0xff]  ;;  %v656_v13 = vld [vmem:[%s1528_s22 + $0x18] sm:$0xff] }
  0x79   : > { %v328_v2 = vunpack.c.l.s4 %v1287_v1  ;;  %v1098_v6 = vld [vmem:[%s1543_s16] ss:$8 sps:$4 sm:$0xff]   ;;  %v1100_v7 = vld [vmem:[%s1543_s16 + $0x4] ss:$8 sps:$4 sm:$0xff]   ;;  %721 = vmatprep.mubr.f32.mxu0 %v654_v12  ;;  %v1558_v17 = vld [vmem:[%s259_s9 + $0x18] sm:$0xff]  ;;  %727 = vmatprep.mubr.f32.mxu1 %v656_v13  ;;  %s923_s18 = sshll.u32 %s1272_s15, 9 }
  0x7a   : > { %v331_v3 = vshrl.u32 %v330_v0, 7  ;;  %v1555_v14 = vld [vmem:[%s259_s9 + $0x8] sm:$0xff]  ;;  %v1560_v18 = vld [vmem:[%s259_s9] sm:$0xff]  ;;  %v1562_v19 = vld [vmem:[%s259_s9 + $0x10] sm:$0xff]  ;;  %s300_s24 = scalar_lea.vmem [#allocation8], %s1524_s10  ;;  %s1678_s30 = scalar_lea.hbm %s1732_s3, %s923_s18 }
  0x7b   : > { %v329_v4 = vunpack.c.0.s8 %v328_v2  ;;  %v1101_v58 = vld [vmem:[%s1543_s16 + $0x10] ss:$8 sps:$4 sm:$0xff]   ;;  %s759_s20 = sshll.u32 %s300_s24, 4  ;;  %s743_s15 = scalar_lea.sflag [#allocation4], %s1521_s21  ;;  %s1680_s20 = int_to_ptr.vmem [resolvable:$true] %s759_s20 }
  0x7c   : > { %v1548_v9 = vsub.s32 0, %v331_v3  ;;  %v1550_v10 = vsub.s32 1, %v331_v3  ;;  %s1194_s6 = scalar_lea.vmem %s1680_s20, 512  ;;  %p1761_p10 = scmp.ne.s32.totalorder %s1747_s25, 0 }
  0x7d   : > { %v1540_v5 = vsub.s32 %v329_v4, %v331_v3  ;;  %p1195_p0 = scmp.ne.s32.totalorder %s1680_s20, %s1194_s6  ;;  %s1288_s8 = smov [#allocation8]  }
  0x7e   : > { %s1198_s26 = sshll.u32 %s1288_s8, 4  ;;  %s1199_s26 = int_to_ptr.vmem [resolvable:$false] %s1198_s26 }
  0x7f   : > { %v333_v8 = vrot.slane %v1098_v6, %v1540_v5  ;;  %v340_v11 = vrot.slane %v1100_v7, %v1540_v5  ;;  %v383_v3 = vrot.slane %v1101_v58, %v1540_v5  ;;  %p1196_p8 = pnand %p1195_p0, %p1761_p10  ;;  %s1200_s1 = scalar_lea.vmem %s1199_s26, 1024 }
  0x80   : > { %p1201_p12 = scmp.lt.s32.totalorder %s1680_s20, %s1199_s26  ;;  %p1202_p1 = scmp.lt.s32.totalorder %s1200_s1, %s1194_s6 }
  0x81   : > { %v341_v15 = vcombine.high %v333_v8, %v333_v8  ;;  %v349_v16 = vrot.slane %v333_v8, %v1540_v5  ;;  %v356_v20 = vrot.slane %v340_v11, %v1540_v5  ;;  %v342_v25 = vcombine.high %v340_v11, %v340_v11  ;;  %p1197_p9 = pneg %p1196_p8 }
  0x82   : > { %p1203_p6 = por %p1202_p1, %p1201_p12 }
  0x83   : > { %v432_v21 = vrot.slane %v349_v16, %v1550_v10  ;;  %v428_v22 = vrot.slane %v349_v16, %v1548_v9  ;;  %v363_v23 = vrot.slane %v341_v15, %v1540_v5  ;;  %v371_v24 = vcombine.high %v349_v16, %v349_v16 }
  0x84   : > { %v464_v37 = vrot.slane %v356_v20, %v1550_v10  ;;  %v370_v51 = vrot.slane %v342_v25, %v1540_v5  ;;  %v460_v52 = vrot.slane %v356_v20, %v1548_v9  ;;  %v372_v53 = vcombine.high %v356_v20, %v356_v20  ;;  %p1204_p13 = pnand %p1203_p6, %p1197_p9 }
  0x85   : > { %v586_v26 = vmul.f32 %v432_v21, %v1555_v14  ;;  %v588_v27 = vmul.f32 %v432_v21, %v1558_v17  ;;  %v585_v28 = vmul.f32 %v428_v22, %v1560_v18  ;;  %v587_v29 = vmul.f32 %v428_v22, %v1562_v19 }
  0x86   : > { %v440_v30 = vrot.slane %v363_v23, %v1550_v10  ;;  %v436_v31 = vrot.slane %v363_v23, %v1548_v9  ;;  %v448_v32 = vrot.slane %v371_v24, %v1550_v10  ;;  %v444_v33 = vrot.slane %v371_v24, %v1548_v9 }
  0x87   : > { %v924_v34 = vpack.c.bf16 %v588_v27, %v586_v26  ;;  %v926_v35 = vpack.c.bf16 %v587_v29, %v585_v28  ;;  %v373_v36 = vcombine.high %v363_v23, %v363_v23  ;;  %v602_v56 = vmul.f32 %v464_v37, %v1555_v14 }
  0x88   : > { %v590_v38 = vmul.f32 %v440_v30, %v1555_v14  ;;  %v592_v39 = vmul.f32 %v440_v30, %v1558_v17  ;;  %v589_v40 = vmul.f32 %v436_v31, %v1560_v18  ;;  %v591_v41 = vmul.f32 %v436_v31, %v1562_v19 }
  0x89   : > { %925 = vmatprep.subr.bf16.mxu0 %v924_v34  ;;  %988 = vmatprep.subr.bf16.mxu1 %v924_v34  ;;  %v594_v42 = vmul.f32 %v448_v32, %v1555_v14  ;;  %v596_v43 = vmul.f32 %v448_v32, %v1558_v17  ;;  %v593_v44 = vmul.f32 %v444_v33, %v1560_v18 }
  0x8a   : > { %927 = vmatpush1.bf16.msra.mxu0 %v926_v35  ;;  %1004 = vmatpush1.bf16.msra.mxu1 %v926_v35  ;;  %v928_v45 = vpack.c.bf16 %v592_v39, %v590_v38  ;;  %v930_v46 = vpack.c.bf16 %v591_v41, %v589_v40  ;;  %v595_v47 = vmul.f32 %v444_v33, %v1562_v19  ;;  %v1103_v40 = vld [vmem:[%s1543_s16 + $0x14] ss:$8 sps:$4 sm:$0xff]  }
  0x8b   : > { %v932_v48 = vpack.c.bf16 %v596_v43, %v594_v42  ;;  %v456_v49 = vrot.slane %v373_v36, %v1550_v10  ;;  %v452_v50 = vrot.slane %v373_v36, %v1548_v9  ;;  %v604_v57 = vmul.f32 %v464_v37, %v1558_v17 }
  0x8c   : > { %929 = vmatprep.subr.bf16.mxu0 %v928_v45  ;;  %989 = vmatprep.subr.bf16.mxu1 %v928_v45  ;;  %v934_v59 = vpack.c.bf16 %v595_v47, %v593_v44  ;;  %v472_v63 = vrot.slane %v370_v51, %v1550_v10  ;;  %v601_v0 = vmul.f32 %v460_v52, %v1560_v18 }
  0x8d   : > { %v598_v54 = vmul.f32 %v456_v49, %v1555_v14  ;;  %v600_v55 = vmul.f32 %v456_v49, %v1558_v17  ;;  %v597_v60 = vmul.f32 %v452_v50, %v1560_v18  ;;  %v599_v61 = vmul.f32 %v452_v50, %v1562_v19 }
  0x8e   : > { %931 = vmatpush1.bf16.msra.mxu0 %v930_v46  ;;  %1005 = vmatpush1.bf16.msra.mxu1 %v930_v46  ;;  %v603_v1 = vmul.f32 %v460_v52, %v1562_v19  ;;  %v468_v2 = vrot.slane %v370_v51, %v1548_v9  ;;  %v940_v6 = vpack.c.bf16 %v604_v57, %v602_v56 }
  0x8f   : > { %933 = vmatprep.subr.bf16.mxu0 %v932_v48  ;;  %990 = vmatprep.subr.bf16.mxu1 %v932_v48  ;;  %v936_v62 = vpack.c.bf16 %v600_v55, %v598_v54  ;;  %v938_v4 = vpack.c.bf16 %v599_v61, %v597_v60  ;;  %v480_v7 = vrot.slane %v372_v53, %v1550_v10 }
  0x90   : > { %v606_v8 = vmul.f32 %v472_v63, %v1555_v14  ;;  %v608_v11 = vmul.f32 %v472_v63, %v1558_v17  ;;  %v374_v12 = vcombine.high %v370_v51, %v370_v51  ;;  %v942_v13 = vpack.c.bf16 %v603_v1, %v601_v0 }
  0x91   : > { %v605_v15 = vmul.f32 %v468_v2, %v1560_v18  ;;  %v607_v16 = vmul.f32 %v468_v2, %v1562_v19  ;;  %v476_v20 = vrot.slane %v372_v53, %v1548_v9  ;;  %v610_v21 = vmul.f32 %v480_v7, %v1555_v14 }
  0x92   : > { %935 = vmatpush1.bf16.msra.mxu0 %v934_v59  ;;  %1006 = vmatpush1.bf16.msra.mxu1 %v934_v59  ;;  %v612_v22 = vmul.f32 %v480_v7, %v1558_v17  ;;  %v399_v23 = vrot.slane %v383_v3, %v1540_v5  ;;  %v944_v24 = vpack.c.bf16 %v608_v11, %v606_v8 }
  0x93   : > { %937 = vmatprep.subr.bf16.mxu0 %v936_v62  ;;  %991 = vmatprep.subr.bf16.mxu1 %v936_v62  ;;  %v488_v25 = vrot.slane %v374_v12, %v1550_v10  ;;  %v391_v26 = vcombine.high %v383_v3, %v383_v3  ;;  %v609_v27 = vmul.f32 %v476_v20, %v1560_v18 }
  0x94   : > { %v611_v28 = vmul.f32 %v476_v20, %v1562_v19  ;;  %v484_v29 = vrot.slane %v374_v12, %v1548_v9  ;;  %v946_v30 = vpack.c.bf16 %v607_v16, %v605_v15  ;;  %v948_v31 = vpack.c.bf16 %v612_v22, %v610_v21 }
  0x95   : > { %v496_v32 = vrot.slane %v399_v23, %v1550_v10  ;;  %v614_v33 = vmul.f32 %v488_v25, %v1555_v14  ;;  %v616_v34 = vmul.f32 %v488_v25, %v1558_v17  ;;  %v413_v35 = vrot.slane %v391_v26, %v1540_v5 }
  0x96   : > { %939 = vmatpush1.bf16.msra.mxu0 %v938_v4  ;;  %1007 = vmatpush1.bf16.msra.mxu1 %v938_v4  ;;  %v950_v36 = vpack.c.bf16 %v611_v28, %v609_v27  ;;  %v613_v37 = vmul.f32 %v484_v29, %v1560_v18  ;;  %v492_v38 = vrot.slane %v399_v23, %v1548_v9 }
  0x97   : > { %941 = vmatprep.subr.bf16.mxu0 %v940_v6  ;;  %992 = vmatprep.subr.bf16.mxu1 %v940_v6  ;;  %v421_v39 = vcombine.high %v399_v23, %v399_v23  ;;  %v615_v41 = vmul.f32 %v484_v29, %v1562_v19  ;;  %v618_v42 = vmul.f32 %v496_v32, %v1555_v14 }
  0x98   : > { %v620_v43 = vmul.f32 %v496_v32, %v1558_v17  ;;  %v952_v44 = vpack.c.bf16 %v616_v34, %v614_v33  ;;  %v504_v45 = vrot.slane %v413_v35, %v1550_v10  ;;  %v617_v46 = vmul.f32 %v492_v38, %v1560_v18 }
  0x99   : > { %v619_v47 = vmul.f32 %v492_v38, %v1562_v19  ;;  %v512_v48 = vrot.slane %v421_v39, %v1550_v10  ;;  %v390_v49 = vrot.slane %v1103_v40, %v1540_v5  ;;  %v954_v50 = vpack.c.bf16 %v615_v41, %v613_v37 }
  0x9a   : > { %943 = vmatpush1.bf16.msra.mxu0 %v942_v13  ;;  %1008 = vmatpush1.bf16.msra.mxu1 %v942_v13  ;;  %v956_v51 = vpack.c.bf16 %v620_v43, %v618_v42  ;;  %v500_v52 = vrot.slane %v413_v35, %v1548_v9  ;;  %v622_v53 = vmul.f32 %v504_v45, %v1555_v14 }
  0x9b   : > { %945 = vmatprep.subr.bf16.mxu0 %v944_v24  ;;  %993 = vmatprep.subr.bf16.mxu1 %v944_v24  ;;  %v624_v54 = vmul.f32 %v504_v45, %v1558_v17  ;;  %v423_v55 = vcombine.high %v413_v35, %v413_v35  ;;  %v958_v56 = vpack.c.bf16 %v619_v47, %v617_v46 }
  0x9c   : > { %v626_v57 = vmul.f32 %v512_v48, %v1555_v14  ;;  %v628_v58 = vmul.f32 %v512_v48, %v1558_v17  ;;  %v508_v59 = vrot.slane %v421_v39, %v1548_v9  ;;  %v621_v60 = vmul.f32 %v500_v52, %v1560_v18 }
  0x9d   : > { %v623_v61 = vmul.f32 %v500_v52, %v1562_v19  ;;  %v406_v62 = vrot.slane %v390_v49, %v1540_v5  ;;  %v960_v63 = vpack.c.bf16 %v624_v54, %v622_v53  ;;  %v520_v0 = vrot.slane %v423_v55, %v1550_v10 }
  0x9e   : > { %947 = vmatpush1.bf16.msra.mxu0 %v946_v30  ;;  %1009 = vmatpush1.bf16.msra.mxu1 %v946_v30  ;;  %v392_v1 = vcombine.high %v390_v49, %v390_v49  ;;  %v625_v2 = vmul.f32 %v508_v59, %v1560_v18  ;;  %v627_v3 = vmul.f32 %v508_v59, %v1562_v19 }
  0x9f   : > { %949 = vmatprep.subr.bf16.mxu0 %v948_v31  ;;  %994 = vmatprep.subr.bf16.mxu1 %v948_v31  ;;  %v516_v4 = vrot.slane %v423_v55, %v1548_v9  ;;  %v962_v6 = vpack.c.bf16 %v623_v61, %v621_v60  ;;  %v964_v7 = vpack.c.bf16 %v628_v58, %v626_v57 }
  0xa0   : > { %v528_v8 = vrot.slane %v406_v62, %v1550_v10  ;;  %v630_v11 = vmul.f32 %v520_v0, %v1555_v14  ;;  %v632_v12 = vmul.f32 %v520_v0, %v1558_v17  ;;  %v420_v13 = vrot.slane %v392_v1, %v1540_v5 }
  0xa1   : > { %v966_v15 = vpack.c.bf16 %v627_v3, %v625_v2  ;;  %v629_v16 = vmul.f32 %v516_v4, %v1560_v18  ;;  %v631_v20 = vmul.f32 %v516_v4, %v1562_v19  ;;  %v524_v21 = vrot.slane %v406_v62, %v1548_v9 }
  0xa2   : > { %951 = vmatpush1.bf16.msra.mxu0 %v950_v36  ;;  %1010 = vmatpush1.bf16.msra.mxu1 %v950_v36  ;;  %v634_v22 = vmul.f32 %v528_v8, %v1555_v14  ;;  %v636_v23 = vmul.f32 %v528_v8, %v1558_v17  ;;  %v422_v24 = vcombine.high %v406_v62, %v406_v62 }
  0xa3   : > { %953 = vmatprep.subr.bf16.mxu0 %v952_v44  ;;  %995 = vmatprep.subr.bf16.mxu1 %v952_v44  ;;  %v968_v25 = vpack.c.bf16 %v632_v12, %v630_v11  ;;  %v536_v26 = vrot.slane %v420_v13, %v1550_v10  ;;  %v970_v5 = vpack.c.bf16 %v631_v20, %v629_v16 }
  0xa4   : > { %v633_v27 = vmul.f32 %v524_v21, %v1560_v18  ;;  %v635_v28 = vmul.f32 %v524_v21, %v1562_v19  ;;  %v972_v29 = vpack.c.bf16 %v636_v23, %v634_v22  ;;  %v532_v30 = vrot.slane %v420_v13, %v1548_v9 }
  0xa5   : > { %v544_v31 = vrot.slane %v422_v24, %v1550_v10  ;;  %v638_v32 = vmul.f32 %v536_v26, %v1555_v14  ;;  %v640_v33 = vmul.f32 %v536_v26, %v1558_v17  ;;  %v424_v34 = vcombine.high %v420_v13, %v420_v13 }
  0xa6   : > { %955 = vmatpush1.bf16.msra.mxu0 %v954_v50  ;;  %1011 = vmatpush1.bf16.msra.mxu1 %v954_v50  ;;  %v974_v35 = vpack.c.bf16 %v635_v28, %v633_v27  ;;  %v540_v36 = vrot.slane %v422_v24, %v1548_v9  ;;  %v637_v37 = vmul.f32 %v532_v30, %v1560_v18 }
  0xa7   : > { %957 = vmatprep.subr.bf16.mxu0 %v956_v51  ;;  %996 = vmatprep.subr.bf16.mxu1 %v956_v51  ;;  %v639_v38 = vmul.f32 %v532_v30, %v1562_v19  ;;  %v642_v39 = vmul.f32 %v544_v31, %v1555_v14  ;;  %v976_v40 = vpack.c.bf16 %v640_v33, %v638_v32 }
  0xa8   : > { %v644_v41 = vmul.f32 %v544_v31, %v1558_v17  ;;  %v552_v42 = vrot.slane %v424_v34, %v1550_v10  ;;  %v641_v43 = vmul.f32 %v540_v36, %v1560_v18  ;;  %v643_v45 = vmul.f32 %v540_v36, %v1562_v19 }
  0xa9   : > { %v978_v44 = vpack.c.bf16 %v639_v38, %v637_v37  ;;  %v548_v46 = vrot.slane %v424_v34, %v1548_v9 }
  0xaa   : > { %959 = vmatpush1.bf16.msra.mxu0 %v958_v56  ;;  %1012 = vmatpush1.bf16.msra.mxu1 %v958_v56  ;;  %v980_v47 = vpack.c.bf16 %v644_v41, %v642_v39  ;;  %v646_v48 = vmul.f32 %v552_v42, %v1555_v14  ;;  %v648_v49 = vmul.f32 %v552_v42, %v1558_v17  ;;  %v653_v14 = vld [vmem:[%s1528_s22] sm:$0xff]  ;;  %v655_v17 = vld [vmem:[%s1528_s22 + $0x10] sm:$0xff] }
  0xab   : > { %961 = vmatprep.subr.bf16.mxu0 %v960_v63  ;;  %997 = vmatprep.subr.bf16.mxu1 %v960_v63  ;;  %v982_v10 = vpack.c.bf16 %v643_v45, %v641_v43  ;;  %v645_v50 = vmul.f32 %v548_v46, %v1560_v18  ;;  %v647_v51 = vmul.f32 %v548_v46, %v1562_v19 }
  0xac   : > { %v984_v9 = vpack.c.bf16 %v648_v49, %v646_v48 }
  0xad   : > { %v986_v52 = vpack.c.bf16 %v647_v51, %v645_v50 }
  0xae   : > { %963 = vmatpush1.bf16.msra.mxu0 %v962_v6  ;;  %1013 = vmatpush1.bf16.msra.mxu1 %v962_v6 }
  0xaf   : > { %965 = vmatprep.subr.bf16.mxu0 %v964_v7  ;;  %998 = vmatprep.subr.bf16.mxu1 %v964_v7 }
  0xb2   : > { %967 = vmatpush1.bf16.msra.mxu0 %v966_v15  ;;  %1014 = vmatpush1.bf16.msra.mxu1 %v966_v15 }
  0xb3   : > { %969 = vmatprep.subr.bf16.mxu0 %v968_v25  ;;  %999 = vmatprep.subr.bf16.mxu1 %v968_v25 }
  0xb6   : > { %971 = vmatpush1.bf16.msra.mxu0 %v970_v5  ;;  %1015 = vmatpush1.bf16.msra.mxu1 %v970_v5 }
  0xb7   : > { %973 = vmatprep.subr.bf16.mxu0 %v972_v29  ;;  %1000 = vmatprep.subr.bf16.mxu1 %v972_v29 }
  0xba   : > { %975 = vmatpush1.bf16.msra.mxu0 %v974_v35  ;;  %1016 = vmatpush1.bf16.msra.mxu1 %v974_v35 }
  0xbb   : > { %977 = vmatprep.subr.bf16.mxu0 %v976_v40  ;;  %1001 = vmatprep.subr.bf16.mxu1 %v976_v40 }
  0xbe   : > { %979 = vmatpush1.bf16.msra.mxu0 %v978_v44  ;;  %1017 = vmatpush1.bf16.msra.mxu1 %v978_v44 }
  0xbf   : > { %981 = vmatprep.subr.bf16.mxu0 %v980_v47  ;;  %1002 = vmatprep.subr.bf16.mxu1 %v980_v47 }
  0xc2   : > { %983 = vmatpush1.bf16.msra.mxu0 %v982_v10  ;;  %1018 = vmatpush1.bf16.msra.mxu1 %v982_v10 }
  0xc3   : > { %985 = vmatprep.subr.bf16.mxu0 %v984_v9  ;;  %1003 = vmatprep.subr.bf16.mxu1 %v984_v9 }
  0xc6   : > { %987 = vmatpush1.bf16.msra.mxu0 %v986_v52  ;;  %1019 = vmatpush1.bf16.msra.mxu1 %v986_v52 }
  0xc9   : > { %722 = vmatmul.mubr.f32.vlgmr.msra.gmra.mrb[0].mxu0 %v653_v14  ;;  %728 = vmatmul.mubr.f32.vlgmr.msra.gmra.mrb[0].mxu1 %v655_v17 }
 0x19c   : > { %v723_v18 = vpop.f32.mrb[0].mxu0  ;;  %v729_v19 = vpop.f32.mrb[0].mxu1 }
 0x19d   : > { %v725_v53 = vpop.f32.mrb[1].mxu0  ;;  %v731_v54 = vpop.f32.mrb[1].mxu1  ;;  %738 = vst [vmem:[%s300_s24] sm:$0xff] %v723_v18  ;;  %740 = vst [vmem:[%s300_s24 + $0x10] sm:$0xff] %v729_v19 }
 0x19e   : > { %739 = vst [vmem:[%s300_s24 + $0x8] sm:$0xff] %v725_v53  ;;  %741 = vst [vmem:[%s300_s24 + $0x18] sm:$0xff] %v731_v54 }
 0x19f   : > { %1207 = shalt.err (!%p1204_p13)
}
 0x1a0   : > { %s1208_s28 = scalar_lea.hbm %s1678_s30, 512  ;;  %s1212_s10 = scalar_lea.hbm %s1732_s3, 1024 }
 0x1a1   : > { %p1209_p11 = scmp.ne.s32.totalorder %s1678_s30, %s1208_s28  ;;  %p1213_p7 = scmp.lt.u32.totalorder %s1678_s30, %s1732_s3 }
 0x1a2   : > { %p1214_p4 = scmp.lt.u32.totalorder %s1212_s10, %s1208_s28  ;;  %p1216_p0 = scmp.lt.u32.totalorder %s1208_s28, %s1678_s30 }
 0x1a3   : > { %p1210_p2 = pnand %p1209_p11, %p1761_p10 }
 0x1a4   : > { %p1215_p3 = por %p1214_p4, %p1213_p7 }
 0x1a5   : > { %p1211_p5 = pneg %p1210_p2 }
 0x1a6   : > { %p1217_p8 = por %p1216_p0, %p1215_p3 }
 0x1a8   : > { %p1218_p9 = pnand %p1217_p8, %p1211_p5 }
 0x1aa   : > { %1221 = shalt.err (!%p1218_p9)
}
 0x1ab   : > { %s1289_s11 = smov 256   ;;  %s1290_s19 = smov 16  }
 0x1ac   : > { %1026 = dma.vmem_to_hbm [thread:$0]  (%p1761_p10), %s1680_s20, 512, %s1678_s30, %s743_s15, %s1289_s11, %s1289_s11, %s1290_s19  }
 0x1ad PF: > { %s774_s9 = sand.u32 1, %s1260_s12   ;;  %p1762_p12 = scmp.ne.s32.totalorder %s1749_s27, 0 }
 0x1ae   : > { %p1763_p1 = scmp.ge.s32.totalorder %s1280_s17, 2  ;;  %s775_s16 = scalar_lea.sflag [#allocation4], %s774_s9 }
 0x1b0   : > { %p1039_p6 = pnand %p1763_p1, %p1762_p12 }
 0x1b2   : > { %1255 = dma.done.wait (!%p1039_p6), %s775_s16, 512  }
 0x1b3   : > { %1257 = vsyncadd (!%p1039_p6), %s775_s16, 4294966784  ;;  %s22_s17 = sadd.s32 1, %s1280_s17   ;;  %s1764_s18 = sld [smem:[#allocation14_spill]] }
 0x1b4   : > { %p19_p13 = scmp.ge.s32.totalorder %s22_s17, 4   ;;  %s1765_s15 = sld [smem:[#allocation12_spill]] }
 0x1b5   : > { %s1766_s16 = sld [smem:[#allocation13_spill]]  ;;  %s1767_s12 = smov %s1264_s13 }
 0x1b6   : > { %s1768_s13 = smov %s1268_s14  ;;  %21 = sbr.rel (!%p19_p13) target bundleno = 10 (0xa), region = 105 }
 0x1b9   : > { %s1769_s14 = smov %s1764_s18 }
 0x1bd   :  { %780 = vsyncpa [#allocation3], 1 }
 0x1be   :  { %782 = vsyncpa [#allocation3 + $0x1], 1 }
 0x1bf   :  { %783 = vsyncpa [#allocation6], 1 }
 0x1c0   :  { %785 = vsyncpa [#allocation6 + $0x1], 1 }
 0x1c1   :  { %786 = vsyncpa [#allocation4], 1 }
 0x1c2   :  { %788 = vsyncpa [#allocation4 + $0x1], 1 }

</bundles_post_ra>
